<compile_context>
chip_gen: v6e
topology: v6e:2x2x1
jax: 0.10.0
libtpu: 0.0.40
codegen_flags: <defaults>
</compile_context>

<pallas_src>
import functools

import jax
import jax.numpy as jnp
from jax.experimental import pallas as pl
from jax.experimental.pallas import tpu as pltpu


def _focal_ce_kernel(logits_ref, target_ref, out_ref, *, ignore_index,
                     n_pixels, tile_pixels):
    """Per-(batch, pixel-tile) masked cross-entropy partial sums.

    logits_ref: (1, C, TL)  raw-dtype logits (upcast to f32 here)
    target_ref: (1, 1, TL)  integer labels (any width; upcast to i32 here)
    out_ref:    (1, 1, 2, 128) f32; row 0 lane 0 = sum(CE), row 1 lane 0 = count
    """
    t_idx = pl.program_id(1)

    x = logits_ref[0].astype(jnp.float32)      # (C, TL), classes on sublanes
    tgt = target_ref[0].astype(jnp.int32)      # (1, TL)
    C, TL = x.shape

    # Numerically-stable per-pixel (per-lane) log-sum-exp over the class rows.
    m = jnp.max(x, axis=0, keepdims=True)                                # (1, TL)
    lse = m + jnp.log(jnp.sum(jnp.exp(x - m), axis=0, keepdims=True))    # (1, TL)

    # Pick the logit at the target class via a one-hot select over class rows
    # (no dynamic gather on TPU); pure per-lane VPU work.
    cls = jax.lax.broadcasted_iota(jnp.int32, (C, TL), 0)                # (C, TL)
    picked = jnp.sum(jnp.where(cls == tgt, x, 0.0), axis=0, keepdims=True)

    ce = lse - picked                                                    # (1, TL)

    # Validity mask: inside the real pixel range (ragged last tile) and not
    # ignore_index. Select-mask (not multiply) so garbage lanes can't inject NaN.
    lane = jax.lax.broadcasted_iota(jnp.int32, (1, TL), 1)
    pix = t_idx * tile_pixels + lane
    valid = jnp.logical_and(pix < n_pixels, tgt != ignore_index)

    loss_s = jnp.sum(jnp.where(valid, ce, 0.0))
    cnt_s = jnp.sum(valid.astype(jnp.float32))

    # Lane-dense (2, 128) output block: [0, 0] = loss partial, [1, 0] = count.
    row = jax.lax.broadcasted_iota(jnp.int32, (2, 128), 0)
    col = jax.lax.broadcasted_iota(jnp.int32, (2, 128), 1)
    blk = jnp.where(col == 0, jnp.where(row == 0, loss_s, cnt_s), 0.0)
    out_ref[...] = blk.reshape(out_ref.shape)


def _round_up(x, m):
    return (x + m - 1) // m * m


def _round_down_128(x):
    return max(0, (x // 128) * 128)


def _tpu_generation():
    """Coarse generation detection for VMEM budgeting."""
    try:
        kind = jax.devices()[0].device_kind.lower()
    except Exception:  # pragma: no cover - defensive
        return "unknown"
    if "v2" in kind or "v3" in kind:
        return "old"
    if "v5 lite" in kind or "v5e" in kind or "v5lite" in kind:
        return "v5e"
    if "7x" in kind or "v7" in kind or kind.startswith("tpu7"):
        return "v7x"
    if "v6" in kind:
        return "v6e"
    return "unknown"


# Per-generation (total-VMEM-estimate budget, vmem_limit_bytes, has 2 TCs).
#  - v5e: 16 MiB scoped default / 128 MiB physical, HBM ~0.82 TB/s
#  - v6e: 32 MiB scoped default / 128 MiB physical, HBM ~1.4 TB/s
#  - v7x: 32 MiB scoped default /  64 MiB physical, HBM ~3.2 TB/s per TC
_MIB = 1024 * 1024
_GEN_CONFIG = {
    "v5e": (14 * _MIB, 24 * _MIB, False),
    "v6e": (26 * _MIB, 40 * _MIB, False),
    "v7x": (40 * _MIB, 52 * _MIB, True),
    "old": (6 * _MIB, None, False),
    "unknown": (12 * _MIB, None, False),
}


def focal_loss_2d(output, target, *, alpha=0.5, gamma=2.0, ignore_index=255,
                  _tile_pixels_override=None):
    """output: (N, C, H, W) float logits; target: (N, H, W) int labels."""
    # TODO(synk): per-class `weight` of nn.CrossEntropyLoss is not implemented
    # (module default weight=None).
    N, C, H, W = output.shape
    L = H * W

    # Free (metadata-only) reshapes: NCHW stays contiguous, no transpose.
    logits = output.reshape(N, C, L)
    # Keep the caller's integer label dtype (no extra HBM pass); only cast if
    # the labels are not an integer type at all.
    tgt = target.reshape(N, 1, L)
    if not jnp.issubdtype(tgt.dtype, jnp.integer):
        tgt = tgt.astype(jnp.int32)

    in_itemsize = jnp.dtype(logits.dtype).itemsize
    tgt_itemsize = jnp.dtype(tgt.dtype).itemsize

    gen = _tpu_generation()
    budget, vmem_limit, two_tc = _GEN_CONFIG[gen]

    # ---- VMEM bytes per pixel of tile TL (conservative) -------------------
    # Sub-32-bit dtypes pack along sublanes, so the sublane padding multiple
    # grows as the dtype narrows (f32 -> 8, bf16 -> 16, int8 -> 32).
    in_sub = max(1, 4 // in_itemsize) * 8
    tgt_sub = max(1, 4 // tgt_itemsize) * 8
    c_pad_in = _round_up(C, in_sub)
    c_pad_f32 = _round_up(C, 8)
    vmem_bpp = (2 * c_pad_in * in_itemsize        # double-buffered logits block
                + 2 * tgt_sub * tgt_itemsize      # double-buffered target block
                + 4 * c_pad_f32 * 4)              # f32 temps: upcast/exp/iota/one-hot
    logits_bpp_hbm = C * in_itemsize              # streamed bytes per pixel (dense)

    tl_budget = max(128, _round_down_128(budget // vmem_bpp))

    # v7x has 2 TensorCores: keep >= ~8 grid steps so both get work, but never
    # shrink a step below ~512 KiB of streamed logits (per-step overhead floor).
    if two_tc and _tile_pixels_override is None:
        min_steps = 8
        want_t = -(-min_steps // N)
        tl_even = _round_up(-(-L // want_t), 128)
        floor_tl = max(128, _round_down_128((512 * 1024) // max(1, logits_bpp_hbm)))
        tl_budget = max(floor_tl, min(tl_budget, tl_even))

    if _tile_pixels_override is not None:
        tl_budget = max(128, _round_down_128(_tile_pixels_override))

    TL = L if L <= tl_budget else tl_budget
    T = (L + TL - 1) // TL          # last tile may overhang; masked in-kernel

    partials = pl.pallas_call(
        functools.partial(_focal_ce_kernel, ignore_index=ignore_index,
                          n_pixels=L, tile_pixels=TL),
        out_shape=jax.ShapeDtypeStruct((N, T, 2, 128), jnp.float32),
        grid=(N, T),
        in_specs=[
            pl.BlockSpec((1, C, TL), lambda n, t: (n, 0, t)),
            pl.BlockSpec((1, 1, TL), lambda n, t: (n, 0, t)),
        ],
        out_specs=pl.BlockSpec((1, 1, 2, 128), lambda n, t: (n, t, 0, 0)),
        compiler_params=pltpu.CompilerParams(
            dimension_semantics=("parallel", "parallel"),
            vmem_limit_bytes=vmem_limit),
    )(logits, tgt)

    loss_sum = jnp.sum(partials[:, :, 0, :])
    count = jnp.sum(partials[:, :, 1, :])

    # Scalar tail identical to the PyTorch forward. Note: if every pixel is
    # ignore_index, count == 0 and this is NaN — same as nn.CrossEntropyLoss.
    logpt = loss_sum / count
    pt = jnp.exp(-logpt)
    loss = (1.0 - pt) ** gamma * alpha * logpt
    return loss  # size_average=True: mean of a scalar == the scalar


def _reference(output, target, *, alpha=0.5, gamma=2.0, ignore_index=255):
    """Pure-JAX reference of the same forward for a correctness check."""
    N, C, H, W = output.shape
    logits = jnp.transpose(output, (0, 2, 3, 1)).reshape(-1, C).astype(jnp.float32)
    tgt = target.reshape(-1).astype(jnp.int32)
    logp = jax.nn.log_softmax(logits, axis=-1)
    safe_tgt = jnp.where(tgt == ignore_index, 0, tgt)
    ce = -jnp.take_along_axis(logp, safe_tgt[:, None], axis=-1)[:, 0]
    valid = (tgt != ignore_index).astype(jnp.float32)
    logpt = jnp.sum(ce * valid) / jnp.sum(valid)
    pt = jnp.exp(-logpt)
    return (1.0 - pt) ** gamma * alpha * logpt


if __name__ == "__main__":
    key = jax.random.PRNGKey(0)
    k1, k2, k3 = jax.random.split(key, 3)

    # Test 1: standard small shape (single tile).
    N, C, H, W = 2, 4, 16, 16
    output = jax.random.normal(k1, (N, C, H, W), dtype=jnp.float32)
    target = jax.random.randint(k2, (N, H, W), 0, C, dtype=jnp.int32)
    ignore_mask = jax.random.bernoulli(k3, 0.1, (N, H, W))
    target = jnp.where(ignore_mask, 255, target)

    loss = jax.block_until_ready(focal_loss_2d(output, target))
    ref = jax.block_until_ready(_reference(output, target))
    assert jnp.allclose(loss, ref, atol=1e-5, rtol=1e-5), (loss, ref)

    # Test 2: ragged last tile on device (L = 400, forced TL = 128, so the
    # final block overhangs and the in-kernel pixel mask is exercised).
    H2, W2 = 20, 20
    output2 = jax.random.normal(k1, (N, C, H2, W2), dtype=jnp.float32)
    target2 = jax.random.randint(k2, (N, H2, W2), 0, C, dtype=jnp.int32)
    target2 = jnp.where(jax.random.bernoulli(k3, 0.1, (N, H2, W2)), 255, target2)

    loss2 = jax.block_until_ready(
        focal_loss_2d(output2, target2, _tile_pixels_override=128))
    ref2 = jax.block_until_ready(_reference(output2, target2))
    assert jnp.allclose(loss2, ref2, atol=1e-5, rtol=1e-5), (loss2, ref2)

    print("KERNEL_OK")
</pallas_src>

<mosaic_0001>
module attributes {stable_mosaic.version = 11 : i64} {
  func.func @_focal_ce_kernel(%arg0: i32, %arg1: i32, %arg2: memref<1x4x256xf32, #tpu.memory_space<vmem>>, %arg3: memref<1x1x256xi32, #tpu.memory_space<vmem>>, %arg4: memref<1x1x2x128xf32, #tpu.memory_space<vmem>>) attributes {dimension_semantics = [#tpu.dimension_semantics<parallel>, #tpu.dimension_semantics<parallel>], iteration_bounds = array<i64: 2, 1>, scalar_prefetch = 0 : i64, scratch_operands = 0 : i64, tpu.core_type = #tpu.core_type<tc>, window_params = [{transform_indices = @transform_0, window_bounds = array<i64: 1, 4, 256>}, {transform_indices = @transform_1, window_bounds = array<i64: 1, 1, 256>}, {transform_indices = @transform_2, window_bounds = array<i64: 1, 1, 2, 128>}]} {
    %c0 = arith.constant 0 : index
    %c0_0 = arith.constant 0 : index
    %c0_1 = arith.constant 0 : index
    %0 = vector.load %arg2[%c0, %c0_0, %c0_1] : memref<1x4x256xf32, #tpu.memory_space<vmem>>, vector<1x4x256xf32>
    %1 = vector.shape_cast %0 : vector<1x4x256xf32> to vector<4x256xf32>
    %c0_2 = arith.constant 0 : index
    %c0_3 = arith.constant 0 : index
    %c0_4 = arith.constant 0 : index
    %2 = vector.load %arg3[%c0_2, %c0_3, %c0_4] : memref<1x1x256xi32, #tpu.memory_space<vmem>>, vector<1x1x256xi32>
    %3 = vector.shape_cast %2 : vector<1x1x256xi32> to vector<1x256xi32>
    %cst = arith.constant dense<0xFF800000> : vector<256xf32>
    %4 = vector.multi_reduction <maximumf>, %1, %cst [0] : vector<4x256xf32> to vector<256xf32>
    %5 = vector.shape_cast %4 : vector<256xf32> to vector<1x256xf32>
    %6 = vector.broadcast %5 : vector<1x256xf32> to vector<4x256xf32>
    %7 = arith.subf %1, %6 : vector<4x256xf32>
    %8 = math.exp %7 : vector<4x256xf32>
    %cst_5 = arith.constant dense<0.000000e+00> : vector<256xf32>
    %9 = vector.multi_reduction <add>, %8, %cst_5 [0] : vector<4x256xf32> to vector<256xf32>
    %10 = vector.shape_cast %9 : vector<256xf32> to vector<1x256xf32>
    %11 = math.log %10 : vector<1x256xf32>
    %12 = arith.addf %5, %11 : vector<1x256xf32>
    %13 = tpu.iota {dimensions = array<i32: 0>} : vector<4x256xi32>
    %14 = vector.broadcast %3 : vector<1x256xi32> to vector<4x256xi32>
    %15 = arith.cmpi eq, %13, %14 : vector<4x256xi32>
    %cst_6 = arith.constant 0.000000e+00 : f32
    %16 = vector.broadcast %cst_6 : f32 to vector<4x256xf32>
    %17 = arith.select %15, %1, %16 : vector<4x256xi1>, vector<4x256xf32>
    %cst_7 = arith.constant dense<0.000000e+00> : vector<256xf32>
    %18 = vector.multi_reduction <add>, %17, %cst_7 [0] : vector<4x256xf32> to vector<256xf32>
    %19 = vector.shape_cast %18 : vector<256xf32> to vector<1x256xf32>
    %20 = arith.subf %12, %19 : vector<1x256xf32>
    %21 = tpu.iota {dimensions = array<i32: 1>} : vector<1x256xi32>
    %c256_i32 = arith.constant 256 : i32
    %22 = arith.muli %arg1, %c256_i32 : i32
    %23 = vector.broadcast %22 : i32 to vector<1x256xi32>
    %24 = arith.addi %23, %21 : vector<1x256xi32>
    %c256_i32_8 = arith.constant 256 : i32
    %25 = vector.broadcast %c256_i32_8 : i32 to vector<1x256xi32>
    %26 = arith.cmpi slt, %24, %25 : vector<1x256xi32>
    %c255_i32 = arith.constant 255 : i32
    %27 = vector.broadcast %c255_i32 : i32 to vector<1x256xi32>
    %28 = arith.cmpi ne, %3, %27 : vector<1x256xi32>
    %29 = arith.andi %26, %28 : vector<1x256xi1>
    %cst_9 = arith.constant 0.000000e+00 : f32
    %30 = vector.broadcast %cst_9 : f32 to vector<1x256xf32>
    %31 = arith.select %29, %20, %30 : vector<1x256xi1>, vector<1x256xf32>
    %32 = vector.shape_cast %31 : vector<1x256xf32> to vector<1x1x256xf32>
    %cst_10 = arith.constant dense<0.000000e+00> : vector<1xf32>
    %33 = vector.multi_reduction <add>, %32, %cst_10 [1, 2] : vector<1x1x256xf32> to vector<1xf32>
    %34 = vector.shape_cast %33 : vector<1xf32> to vector<1x1x1xf32>
    %35 = vector.extract %34[0, 0, 0] : f32 from vector<1x1x1xf32>
    %36 = arith.extui %29 : vector<1x256xi1> to vector<1x256xi32>
    %37 = arith.sitofp %36 : vector<1x256xi32> to vector<1x256xf32>
    %38 = vector.shape_cast %37 : vector<1x256xf32> to vector<1x1x256xf32>
    %cst_11 = arith.constant dense<0.000000e+00> : vector<1xf32>
    %39 = vector.multi_reduction <add>, %38, %cst_11 [1, 2] : vector<1x1x256xf32> to vector<1xf32>
    %40 = vector.shape_cast %39 : vector<1xf32> to vector<1x1x1xf32>
    %41 = vector.extract %40[0, 0, 0] : f32 from vector<1x1x1xf32>
    %42 = tpu.iota {dimensions = array<i32: 0>} : vector<2x128xi32>
    %43 = tpu.iota {dimensions = array<i32: 1>} : vector<2x128xi32>
    %c0_i32 = arith.constant 0 : i32
    %44 = vector.broadcast %c0_i32 : i32 to vector<2x128xi32>
    %45 = arith.cmpi eq, %43, %44 : vector<2x128xi32>
    %c0_i32_12 = arith.constant 0 : i32
    %46 = vector.broadcast %c0_i32_12 : i32 to vector<2x128xi32>
    %47 = arith.cmpi eq, %42, %46 : vector<2x128xi32>
    %48 = vector.broadcast %35 : f32 to vector<2x128xf32>
    %49 = vector.broadcast %41 : f32 to vector<2x128xf32>
    %50 = arith.select %47, %48, %49 : vector<2x128xi1>, vector<2x128xf32>
    %cst_13 = arith.constant 0.000000e+00 : f32
    %51 = vector.broadcast %cst_13 : f32 to vector<2x128xf32>
    %52 = arith.select %45, %50, %51 : vector<2x128xi1>, vector<2x128xf32>
    %53 = vector.shape_cast %52 : vector<2x128xf32> to vector<1x1x2x128xf32>
    %c0_14 = arith.constant 0 : index
    %c0_15 = arith.constant 0 : index
    %c0_16 = arith.constant 0 : index
    %c0_17 = arith.constant 0 : index
    %54 = vector.load %arg4[%c0_14, %c0_15, %c0_16, %c0_17] : memref<1x1x2x128xf32, #tpu.memory_space<vmem>>, vector<1x1x2x128xf32>
    tpu.vector_store %arg4[%c0_14, %c0_15, %c0_16, %c0_17], %53 {strides = array<i32>} : memref<1x1x2x128xf32, #tpu.memory_space<vmem>>, vector<1x1x2x128xf32>,
    return
  }
  func.func @transform_0(%arg0: i32, %arg1: i32) -> (i32, i32, i32) {
    %c0_i32 = arith.constant 0 : i32
    %c0_i32_0 = arith.constant 0 : i32
    return %arg0, %c0_i32, %arg1 : i32, i32, i32
  }
  func.func @transform_1(%arg0: i32, %arg1: i32) -> (i32, i32, i32) {
    %c0_i32 = arith.constant 0 : i32
    %c0_i32_0 = arith.constant 0 : i32
    return %arg0, %c0_i32, %arg1 : i32, i32, i32
  }
  func.func @transform_2(%arg0: i32, %arg1: i32) -> (i32, i32, i32, i32) {
    %c0_i32 = arith.constant 0 : i32
    %c0_i32_0 = arith.constant 0 : i32
    %c0_i32_1 = arith.constant 0 : i32
    return %arg0, %arg1, %c0_i32, %c0_i32_0 : i32, i32, i32, i32
  }
}

</mosaic_0001>

<bundles_post_ra>
// kernel: tpu_custom_call.1
= control target key start
LH: loop header
LB: loop body
LE: loop exit
PB: predicated region body
PF: predicated region fallthrough
CT: control target
= control target key end

     0   :  { %7 = vsyncpa [#allocation3], 0  ;;  %s939_s0 = inlined_call_operand.hbm [shape: f32[2,4,256], index: 0, kind: input, shape index: {}]   ;;  %s940_s1 = inlined_call_operand.hbm [shape: s32[2,1,256], index: 1, kind: input, shape index: {}]   ;;  %s941_s2 = inlined_call_operand.hbm [shape: f32[2,1,2,128], index: 2, kind: output, shape index: {}]  }
   0x1   :  { %9 = vsyncpa [#allocation3 + $0x1], 0 }
   0x2   :  { %10 = vsyncpa [#allocation6], 0 }
   0x3   :  { %12 = vsyncpa [#allocation6 + $0x1], 0 }
   0x4   :  { %13 = vsyncpa [#allocation4], 0 }
   0x5   :  { %15 = vsyncpa [#allocation4 + $0x1], 0  ;;  %s750_s9 = smov 0   ;;  %s752_s10 = smov 0  }
   0x6   :  { %s754_s11 = smov 0   ;;  %s756_s12 = smov 0  }
   0x7   :  { %s758_s13 = smov 0   ;;  %s760_s14 = smov 0  }
   0x8 LB: > { %s486_s15 = sadd.s32 4294967295, %s728_s14   ;;  %s487_s16 = sadd.s32 4294967294, %s728_s14   ;;  %s728_s14 = sphi %s760_s14, %s21_s14   ;;  %s724_s13 = sphi %s758_s13, %s953_s13   ;;  %s720_s12 = sphi %s756_s12, %s952_s12   ;;  %s716_s11 = sphi %s754_s11, %s951_s11   ;;  %s712_s10 = sphi %s752_s10, %s950_s10   ;;  %s708_s9 = sphi %s750_s9, %s949_s9  }
   0x9   : > { %s33_s17 = sadd.s32 1, %s724_s13  ;;  %s42_s18 = sadd.s32 1, %s716_s11 }
   0xa   : > { %p35_p0 = scmp.ge.s32.totalorder %s33_s17, 2  ;;  %p49_p1 = scmp.ne.s32.totalorder %s716_s11, %s712_s10 }
   0xb   : > { %p50_p2 = scmp.eq.s32.totalorder %s728_s14, 0  ;;  %p55_p3 = scmp.ne.s32.totalorder %s712_s10, %s708_s9 }
   0xc   : > { %s955_s17 = smov (%p35_p0, %s33_s17), 0  ;;  %p56_p5 = scmp.eq.s32.totalorder %s486_s15, 0 }
   0xd   : > { %p791_p4 = por %p50_p2, %p49_p1  ;;  %s37_s20 = ssub.s32 %s724_s13, %s955_s17 }
   0xe   : > { %p109_p6 = scmp.eq.s32.totalorder %s486_s15, 1  ;;  %p40_p7 = scmp.eq.s32.totalorder %s37_s20, 0 }
   0xf   : > { %p797_p8 = por %p56_p5, %p55_p3  ;;  %p115_p10 = scmp.eq.s32.totalorder %s487_s16, 1 }
  0x10   : > { %p801_p9 = por %p109_p6, %p49_p1  ;;  %p529_p13 = scmp.lt.s32.totalorder %s728_s14, 2 }
  0x11   : > { %s806_s23 = scalar_select %p40_p7, %s716_s11, %s42_s18  }
  0x12   : > { %p808_p11 = por %p115_p10, %p55_p3  ;;  %s815_s25 = sand.u32 1, %s716_s11  }
  0x13   : > { %s490_s26 = sshll.u32 %s815_s25, 3  ;;  %s506_s27 = sshll.u32 %s724_s13, 7 }
  0x14   : > { %s147_s30 = scalar_lea.hbm %s939_s0, %s506_s27  ;;  %s139_s3 = scalar_lea.vmem [#allocation2], %s490_s26 }
  0x15   : > { %s149_s4 = sshll.u32 %s139_s3, 4  ;;  %p824_p0 = pnand %p529_p13, %p791_p4  ;;  %s150_s4 = int_to_ptr.vmem [resolvable:$true] %s149_s4 }
  0x16   : > { %p496_p1 = scmp.ge.s32.totalorder %s728_s14, 1  ;;  %p175_p2 = scmp.lt.s32.totalorder %s728_s14, 3 }
  0x17   : > { %s136_s6 = scalar_lea.sflag [#allocation3], %s815_s25  ;;  %p590_p3 = pneg %p824_p0 }
  0x18   : > { %s601_s7 = scalar_lea.vmem %s150_s4, 128  ;;  %s730_s8 = smov [#allocation2]  }
  0x19   : > { %p602_p5 = scmp.ne.s32.totalorder %s150_s4, %s601_s7  ;;  %s606_s15 = sshll.u32 %s730_s8, 4  ;;  %s607_s15 = int_to_ptr.vmem [resolvable:$false] %s606_s15 }
  0x1a   : > { %s608_s16 = scalar_lea.vmem %s607_s15, 256  ;;  %p609_p4 = scmp.lt.s32.totalorder %s150_s4, %s607_s15 }
  0x1b   : > { %p604_p6 = pnand %p602_p5, %p590_p3  ;;  %p610_p10 = scmp.lt.s32.totalorder %s608_s16, %s601_s7 }
  0x1d   : > { %p605_p7 = pneg %p604_p6  ;;  %p611_p13 = por %p610_p10, %p609_p4 }
  0x1f   : > { %p612_p12 = pnand %p611_p13, %p605_p7 }
  0x21   : > { %615 = shalt.err (!%p612_p12)
}
  0x22   : > { %521 = dma.hbm_to_vmem [thread:$0]  (!%p824_p0), %s147_s30, 128, %s150_s4, %s136_s6  }
  0x23   : > { %p842_p5 = pnand %p496_p1, %p175_p2  ;;  %s493_s19 = sshll.u32 %s815_s25, 1 }
  0x24   : > { %s507_s20 = sshll.u32 %s724_s13, 5  ;;  %s160_s29 = scalar_lea.vmem [#allocation5], %s493_s19 }
  0x25   : > { %s168_s28 = scalar_lea.hbm %s940_s1, %s507_s20  ;;  %s170_s3 = sshll.u32 %s160_s29, 4  ;;  %s171_s3 = int_to_ptr.vmem [resolvable:$true] %s170_s3 }
  0x26   : > { %s157_s7 = scalar_lea.sflag [#allocation6], %s815_s25  ;;  %s629_s8 = scalar_lea.vmem %s171_s3, 32 }
  0x27   : > { %p630_p12 = scmp.ne.s32.totalorder %s171_s3, %s629_s8  ;;  %s731_s30 = smov [#allocation5]  }
  0x28   : > { %s634_s4 = sshll.u32 %s731_s30, 4  ;;  %s635_s4 = int_to_ptr.vmem [resolvable:$false] %s634_s4 }
  0x29   : > { %p632_p6 = pnand %p630_p12, %p590_p3  ;;  %s636_s6 = scalar_lea.vmem %s635_s4, 64 }
  0x2a   : > { %p637_p1 = scmp.lt.s32.totalorder %s171_s3, %s635_s4  ;;  %p638_p2 = scmp.lt.s32.totalorder %s636_s6, %s629_s8 }
  0x2b   : > { %p633_p7 = pneg %p632_p6 }
  0x2c   : > { %p639_p4 = por %p638_p2, %p637_p1 }
  0x2e   : > { %p640_p10 = pnand %p639_p4, %p633_p7 }
  0x30   : > { %643 = shalt.err (!%p640_p10)
}
  0x31   : > { %524 = dma.hbm_to_vmem [thread:$0]  (!%p824_p0), %s168_s28, 32, %s171_s3, %s157_s7  }
  0x32   : > { %179 = sbr.rel (%p842_p5) target bundleno = 354 (0x162), region = 28  ;;  %s860_s25 = sand.u32 (!%p842_p5), 1, %s712_s10  }
  0x33   : > { %s497_s15 = sshll.u32 (!%p842_p5), %s860_s25, 3  ;;  %s182_s16 = scalar_lea.sflag (!%p842_p5), [#allocation3], %s860_s25 }
  0x34   : > { %s185_s19 = scalar_lea.vmem (!%p842_p5), [#allocation2], %s497_s15 }
  0x37   : > { %695 = dma.done.wait (%p797_p8), %s182_s16, 128  }
  0x38   : > { %697 = vsyncadd (%p797_p8), %s182_s16, 4294967168  ;;  %s498_s5 = sshll.u32 %s860_s25, 1  ;;  %s191_s18 = scalar_lea.sflag [#allocation6], %s860_s25 }
  0x39   : > { %s194_s20 = scalar_lea.vmem [#allocation5], %s498_s5 }
  0x3a   : > { %699 = dma.done.wait (%p797_p8), %s191_s18, 32  }
  0x3b   : > { %701 = vsyncadd (%p797_p8), %s191_s18, 4294967264  ;;  %vm227_vm0 = vcmask 1043456   ;;  %v222_v0 = vld [vmem:[%s185_s19] sm:$0xff]  ;;  %v272_v18 = vlaneseq  ;;  %v223_v22 = vld [vmem:[%s194_s20] sm:$0x3]  ;;  %v732_v55 = vmov 0  }
  0x3c   : > { %v225_v1 = vcombine.high %v222_v0, %v222_v0  ;;  %v228_v2 = vsel %vm227_vm0, %v222_v0, -inf  ;;  %vm311_vm3 = vcmp.ne.s32.totalorder %v223_v22, 255  ;;  %vm327_vm5 = vcmask 1040384   ;;  %s503_s26 = sshll.u32 %s720_s12, 5  ;;  %s219_s27 = scalar_lea.vmem [#allocation7], %s498_s5 }
  0x3d   : > { %v229_v3 = vrot.slane %v228_v2, 4  ;;  %v879_v20 = vshrl.u32 %v272_v18, 7  ;;  %v312_v56 = vsel %vm311_vm3, 1, %v732_v55  ;;  %s378_s28 = sshll.u32 %s219_s27, 4  ;;  %s897_s8 = scalar_lea.hbm %s941_s2, %s503_s26  ;;  %s379_s28 = int_to_ptr.vmem [resolvable:$true] %s378_s28 }
  0x3e   : > { %v235_v4 = vsel %vm227_vm0, %v225_v1, -inf  ;;  %s364_s30 = scalar_lea.sflag [#allocation4], %s860_s25  ;;  %s644_s4 = scalar_lea.vmem %s379_s28, 32 }
  0x3f   : > { %v230_v5 = vmax.f32 %v228_v2, %v229_v3  ;;  %v236_v6 = vrot.slane %v235_v4, 4  ;;  %v276_v21 = vsub.s32 0, %v879_v20  ;;  %v280_v23 = vsub.s32 1, %v879_v20  ;;  %p645_p8 = scmp.ne.s32.totalorder %s379_s28, %s644_s4  ;;  %s734_s12 = smov [#allocation7]  }
  0x40   : > { %vm357_vm7 = vcmp.eq.s32.totalorder %v879_v20, 0  ;;  %s648_s6 = sshll.u32 %s734_s12, 4  ;;  %s649_s6 = int_to_ptr.vmem [resolvable:$false] %s648_s6 }
  0x41   : > { %v231_v7 = vrot.slane %v230_v5, 2  ;;  %v237_v8 = vmax.f32 %v235_v4, %v236_v6  ;;  %v277_v24 = vrot.slane %v223_v22, %v276_v21  ;;  %v281_v25 = vrot.slane %v223_v22, %v280_v23  ;;  %p646_p0 = pnand %p645_p8, %p801_p9  ;;  %s650_s15 = scalar_lea.vmem %s649_s6, 64 }
  0x42   : > { %v316_v59 = vrot.slane %v312_v56, %v276_v21  ;;  %v320_v63 = vrot.slane %v312_v56, %v280_v23  ;;  %p651_p13 = scmp.lt.s32.totalorder %s379_s28, %s649_s6  ;;  %p652_p5 = scmp.lt.s32.totalorder %s650_s15, %s644_s4 }
  0x43   : > { %v232_v9 = vmax.f32 %v230_v5, %v231_v7  ;;  %v238_v10 = vrot.slane %v237_v8, 2  ;;  %vm282_vm1 = vcmp.eq.s32.totalorder %v879_v20, %v277_v24  ;;  %vm283_vm2 = vcmp.eq.s32.totalorder %v879_v20, %v281_v25  ;;  %p647_p3 = pneg %p646_p0 }
  0x44   : > { %v284_v30 = vsel %vm282_vm1, %v222_v0, 0.0  ;;  %v285_v34 = vsel %vm283_vm2, %v225_v1, 0.0  ;;  %vm321_vm4 = vcmp.ne.s32.totalorder %v316_v59, 0  ;;  %vm322_vm6 = vcmp.ne.s32.totalorder %v320_v63, 0  ;;  %p653_p12 = por %p652_p5, %p651_p13 }
  0x45   : > { %v233_v11 = vrot.slane %v232_v9, 1  ;;  %v239_v12 = vmax.f32 %v237_v8, %v238_v10  ;;  %v286_v35 = vsel %vm227_vm0, %v284_v30, 0.0  ;;  %v293_v38 = vsel %vm227_vm0, %v285_v34, 0.0 }
  0x46   : > { %v287_v41 = vrot.slane %v286_v35, 4  ;;  %v294_v44 = vrot.slane %v293_v38, 4  ;;  %v733_v7 = vmov 0.0   ;;  %p654_p6 = pnand %p653_p12, %p647_p3 }
  0x47   : > { %v234_v13 = vmax.f32 %v232_v9, %v233_v11  ;;  %v240_v14 = vrot.slane %v239_v12, 1  ;;  %v500_v8 = vsel %vm321_vm4, 1.0, %v733_v7  ;;  %v501_v9 = vsel %vm322_vm6, 1.0, %v733_v7 }
  0x48   : > { %v288_v47 = vadd.f32 %v287_v41, %v286_v35  ;;  %v295_v49 = vadd.f32 %v294_v44, %v293_v38 }
  0x49   : > { %v241_v15 = vmax.f32 %v239_v12, %v240_v14  ;;  %v344_v14 = vsel %vm327_vm5, %v500_v8, 0.0 }
  0x4a   : > { %v289_v50 = vrot.slane %v288_v47, 2  ;;  %v296_v51 = vrot.slane %v295_v49, 2 }
  0x4b   : > { %v244_v16 = vcombine.low %v234_v13, %v241_v15 }
  0x4c   : > { %v290_v52 = vadd.f32 %v289_v50, %v288_v47  ;;  %v297_v53 = vadd.f32 %v296_v51, %v295_v49 }
  0x4d   : > { %v246_v17 = vsub.f32 %v222_v0, %v244_v16  ;;  %v345_v16 = vsel %vm327_vm5, %v501_v9, 0.0 }
  0x4e   : > { %v291_v54 = vrot.slane %v290_v52, 1  ;;  %v298_v57 = vrot.slane %v297_v53, 1 }
  0x4f   : > { %v247_v19 = vmul.f32 1.442695, %v246_v17 }
  0x50   : > { %v292_v61 = vadd.f32 %v291_v54, %v290_v52  ;;  %v299_v2 = vadd.f32 %v298_v57, %v297_v53 }
  0x51   : > { %582 = vpow2.f32 %v247_v19  ;;  %v346_v19 = vadd.f32 %v345_v16, %v344_v14 }
  0x5e   : > { %v583_v26 = vpop.eup %582 }
  0x5f   : > { %v250_v27 = vcombine.high %v583_v26, %v583_v26  ;;  %v252_v28 = vsel %vm227_vm0, %v583_v26, 0.0 }
  0x60   : > { %v253_v29 = vrot.slane %v252_v28, 4 }
  0x61   : > { %v259_v31 = vsel %vm227_vm0, %v250_v27, 0.0 }
  0x62   : > { %v254_v32 = vadd.f32 %v253_v29, %v252_v28  ;;  %v260_v33 = vrot.slane %v259_v31, 4 }
  0x64   : > { %v255_v36 = vrot.slane %v254_v32, 2  ;;  %v261_v37 = vadd.f32 %v260_v33, %v259_v31  ;;  %v303_v33 = vand.u32 127, %v272_v18 }
  0x66   : > { %v256_v39 = vadd.f32 %v255_v36, %v254_v32  ;;  %v262_v40 = vrot.slane %v261_v37, 2  ;;  %vm356_vm8 = vcmp.eq.s32.totalorder %v303_v33, 0 }
  0x68   : > { %v257_v42 = vrot.slane %v256_v39, 1  ;;  %v263_v43 = vadd.f32 %v262_v40, %v261_v37 }
  0x6a   : > { %v258_v45 = vadd.f32 %v257_v42, %v256_v39  ;;  %v264_v46 = vrot.slane %v263_v43, 1 }
  0x6c   : > { %v265_v48 = vadd.f32 %v264_v46, %v263_v43  ;;  %584 = vlog2.f32 %v258_v45 }
  0x6e   : > { %586 = vlog2.f32 %v265_v48 }
  0x79   : > { %v585_v58 = vpop.eup %584 }
  0x7a   : > { %v267_v60 = vmul.f32 0.6931472, %v585_v58 }
  0x7b   : > { %v587_v62 = vpop.eup %586 }
  0x7c   : > { %v269_v0 = vmul.f32 0.6931472, %v587_v62  ;;  %v270_v1 = vadd.f32 %v267_v60, %v234_v13 }
  0x7e   : > { %v271_v3 = vadd.f32 %v269_v0, %v241_v15  ;;  %v300_v4 = vsub.f32 %v270_v1, %v292_v61 }
  0x80   : > { %v301_v5 = vsub.f32 %v271_v3, %v299_v2  ;;  %v325_v6 = vsel %vm321_vm4, %v300_v4, 0.0 }
  0x81   : > { %v328_v10 = vsel %vm327_vm5, %v325_v6, 0.0 }
  0x82   : > { %v326_v11 = vsel %vm322_vm6, %v301_v5, 0.0 }
  0x83   : > { %v329_v12 = vsel %vm327_vm5, %v326_v11, 0.0 }
  0x84   : > { %v330_v17 = vadd.f32 %v329_v12, %v328_v10 }
  0x86   : > { %331 = vadd.xlane.f32.xlu0 %v330_v17 }
  0x8a   : > { %347 = vadd.xlane.f32.xlu0 %v346_v19 }
 0x10f   : > { %v332_v13 = vpop.xlane.xlu0 %331 }
 0x110   : > { %v333_v21 = vrot.slane %v332_v13, 4 }
 0x112   : > { %v334_v15 = vadd.f32 %v333_v21, %v332_v13 }
 0x113   : > { %v348_v22 = vpop.xlane.xlu0 %347 }
 0x114   : > { %v335_v23 = vrot.slane %v334_v15, 2  ;;  %v349_v24 = vrot.slane %v348_v22, 4 }
 0x116   : > { %v350_v25 = vadd.f32 %v349_v24, %v348_v22  ;;  %v336_v26 = vadd.f32 %v335_v23, %v334_v15 }
 0x118   : > { %v351_v27 = vrot.slane %v350_v25, 2  ;;  %v337_v28 = vrot.slane %v336_v26, 1 }
 0x11a   : > { %v352_v29 = vadd.f32 %v351_v27, %v350_v25  ;;  %v338_v30 = vadd.f32 %v337_v28, %v336_v26 }
 0x11c   : > { %508 = vpush %v338_v30  ;;  %v353_v31 = vrot.slane %v352_v29, 1 }
 0x11e   : > { %v354_v32 = vadd.f32 %v353_v31, %v352_v29 }
 0x120   : > { %510 = vpush %v354_v32 }
 0x14d   : > { %s509_s21 = spop %508 }
 0x14e   : > { %v358_v34 = vstv %s509_s21 }
 0x151   : > { %s511_s29 = spop %510 }
 0x152   : > { %v359_v35 = vstv %s511_s29 }
 0x153   : > { %v360_v36 = vsel %vm357_vm7, %v358_v34, %v359_v35 }
 0x154   : > { %v361_v18 = vsel %vm356_vm8, %v360_v36, 0.0 }
 0x155   : > { %362 = vst [vmem:[%s219_s27] sm:$0x3] %v361_v18 }
 0x156   : > { %657 = shalt.err (!%p654_p6)
}
 0x157   : > { %s658_s16 = scalar_lea.hbm %s897_s8, 32  ;;  %s662_s5 = scalar_lea.hbm %s941_s2, 64 }
 0x158   : > { %p659_p7 = scmp.ne.s32.totalorder %s897_s8, %s658_s16  ;;  %p663_p4 = scmp.lt.s32.totalorder %s897_s8, %s941_s2 }
 0x159   : > { %p664_p10 = scmp.lt.s32.totalorder %s662_s5, %s658_s16 }
 0x15a   : > { %p660_p1 = pnand %p659_p7, %p801_p9 }
 0x15b   : > { %p665_p8 = por %p664_p10, %p663_p4 }
 0x15c   : > { %p661_p2 = pneg %p660_p1 }
 0x15e   : > { %p666_p0 = pnand %p665_p8, %p661_p2 }
 0x160   : > { %669 = shalt.err (!%p666_p0)
}
 0x161   : > { %516 = dma.vmem_to_hbm [thread:$0]  (%p801_p9), %s379_s28, 32, %s897_s8, %s364_s30  }
 0x162 PF: > { %s390_s21 = sand.u32 1, %s708_s9   ;;  %p948_p3 = scmp.ge.s32.totalorder %s728_s14, 2 }
 0x163   : > { %s391_s26 = scalar_lea.sflag [#allocation4], %s390_s21 }
 0x164   : > { %p526_p13 = pnand %p948_p3, %p808_p11 }
 0x166   : > { %p527_p5 = pneg %p526_p13 }
 0x168   : > { %703 = dma.done.wait (%p527_p5), %s391_s26, 32  }
 0x169   : > { %705 = vsyncadd (%p527_p5), %s391_s26, 4294967264  ;;  %s21_s14 = sadd.s32 1, %s728_s14   ;;  %s949_s9 = smov %s712_s10 }
 0x16a   : > { %p18_p12 = scmp.ge.s32.totalorder %s21_s14, 4   ;;  %s950_s10 = smov %s716_s11 }
 0x16b   : > { %s951_s11 = smov %s806_s23  ;;  %s952_s12 = smov %s724_s13 }
 0x16c   : > { %s953_s13 = smov %s955_s17  ;;  %20 = sbr.rel (!%p18_p12) target bundleno = 8 (0x8), region = 86 }
 0x171   :  { %396 = vsyncpa [#allocation3], 1 }
 0x172   :  { %398 = vsyncpa [#allocation3 + $0x1], 1 }
 0x173   :  { %399 = vsyncpa [#allocation6], 1 }
 0x174   :  { %401 = vsyncpa [#allocation6 + $0x1], 1 }
 0x175   :  { %402 = vsyncpa [#allocation4], 1 }
 0x176   :  { %404 = vsyncpa [#allocation4 + $0x1], 1 }

</bundles_post_ra>
